<compile_context>
chip_gen: v7x
topology: tpu7x:2x2x1
jax: 0.10.0
libtpu: 0.0.40
codegen_flags: <defaults>
</compile_context>

<pallas_src>
import math
import functools

import jax
import jax.numpy as jnp
from jax import lax
from jax.experimental import pallas as pl
from jax.experimental.pallas import tpu as pltpu


def _pick_batch_tile(B, N, max_lanes=4096):
    """Batch group per grid step. Prefer one block spanning all lanes; otherwise the largest
    divisor of B whose lane width Bt*N is a multiple of 128 (keeps BlockSpec legal)."""
    if B * N <= max_lanes:
        return B
    best = 1
    for bt in range(1, B + 1):
        if B % bt == 0 and bt * N <= max_lanes and (bt * N) % 128 == 0:
            best = bt
    return best if (best * N) % 128 == 0 else B


def _tca_kernel(num_heads, batch_tile, npts,
                x_ref, wq_ref, cent_ref, v_ref, wt_ref, bias_ref,
                out_ref, xr_ref):
    # x_ref: (C, L) block, L = batch_tile * npts, lanes ordered batch-major (b, n).
    x = x_ref[...]                                             # (C, L)
    C, L = x.shape
    ch = C // num_heads
    M = cent_ref.shape[-1]

    # q_conv (1x1, no bias): one lane-dense MXU matmul covering all batch_tile batches.
    q = jnp.dot(wq_ref[...], x, preferred_element_type=jnp.float32)        # (C, L)
    k = cent_ref[...]                                          # (C, M)
    v = v_ref[...]                                             # (C, M)  precomputed Wv@centers+bv

    # Per-head attention; all batch_tile batches share one (L, M) energy / softmax.
    # Head slices live on the sublane axis (offsets h*ch), never on lanes.
    for h in range(num_heads):   # static unroll; for large H switch to fori_loop + pl.ds
        qh = q[h * ch:(h + 1) * ch, :]                         # (ch, L)
        kh = k[h * ch:(h + 1) * ch, :]                         # (ch, M)
        vh = v[h * ch:(h + 1) * ch, :]                         # (ch, M)

        # energy[(b,n), m] = sum_c qh[c,(b,n)] * kh[c,m]
        energy = lax.dot_general(qh, kh, (((0,), (0,)), ((), ())),
                                 preferred_element_type=jnp.float32)       # (L, M)

        # softmax over centers (lane axis); reciprocal goes to the EUP.
        emax = jnp.max(energy, axis=-1, keepdims=True)
        p = jnp.exp(energy - emax)
        att = p * pl.reciprocal(jnp.sum(p, axis=-1, keepdims=True), approx=True)

        # renormalize over the points axis, independently per batch in the group
        # (segmented sublane reduction via a sublane-split reshape).
        att3 = att.reshape(batch_tile, npts, M)
        colsum = jnp.sum(att3, axis=1, keepdims=True)                      # (Bt, 1, M)
        att3 = att3 * pl.reciprocal(1e-9 + colsum, approx=True)
        att = att3.reshape(L, M)

        # x_r[c,(b,n)] = sum_m vh[c,m] * att[(b,n),m] — accumulate into the scratch slab.
        xr_ref[h * ch:(h + 1) * ch, :] = lax.dot_general(
            vh, att, (((1,), (1,)), ((), ())), preferred_element_type=jnp.float32)

    # trans_conv with BatchNorm folded into weights/bias, ReLU, residual; one full-tile store.
    y = jnp.dot(wt_ref[...], xr_ref[...] - x,
                preferred_element_type=jnp.float32) + bias_ref[...]
    out_ref[...] = (x + jnp.maximum(y, 0.0)).astype(out_ref.dtype)


def tcenter_attention_forward(local_x, t_embed, f_p, *,
                              centers, wq, wv, bv, wt, bt,
                              bn_gamma, bn_beta, bn_mean, bn_var, bn_eps=1e-5,
                              num_heads=1, batch_tile=None):
    """local_x: [B, C, N]; t_embed: [B, C] or None; f_p: unused (matches module)."""
    del f_p  # not used by the reference module's forward
    B, C, N = local_x.shape
    M = centers.shape[1]
    assert C % num_heads == 0
    f32 = jnp.float32

    x = local_x.astype(f32)
    if t_embed is not None:
        x = x + t_embed.astype(f32)[:, :, None]

    # Layout plumbing (wrapper side): channels on sublanes, batch*points on lanes, so the
    # 1x1 convs are single lane-dense MXU matmuls and output stores are not lane-masked.
    if batch_tile is None:
        batch_tile = _pick_batch_tile(B, N)
    assert B % batch_tile == 0
    L = batch_tile * N
    x_flat = jnp.transpose(x, (1, 0, 2)).reshape(C, B * N)     # (C, B*N), batch-major lanes

    # Batch-independent precompute hoisted out of the kernel (was recomputed per grid step).
    centers_f = centers.astype(f32)
    v = jnp.dot(wv.astype(f32), centers_f) + bv.astype(f32)[:, None]       # (C, M)
    inv_std = 1.0 / jnp.sqrt(bn_var.astype(f32) + bn_eps)
    scale = bn_gamma.astype(f32) * inv_std                                 # (C,)
    wt_fold = scale[:, None] * wt.astype(f32)                              # (C, C)
    bias_fold = (scale * bt.astype(f32) + bn_beta.astype(f32)
                 - bn_mean.astype(f32) * scale)[:, None]                   # (C, 1)

    kernel = functools.partial(_tca_kernel, num_heads, batch_tile, N)

    out_flat = pl.pallas_call(
        kernel,
        out_shape=jax.ShapeDtypeStruct((C, B * N), f32),
        grid_spec=pltpu.PrefetchScalarGridSpec(
            num_scalar_prefetch=0,
            grid=(B // batch_tile,),
            in_specs=[
                pl.BlockSpec((C, L), lambda g: (0, g)),        # x, per-batch-group tile
                pl.BlockSpec((C, C), lambda g: (0, 0)),        # Wq        (VMEM resident)
                pl.BlockSpec((C, M), lambda g: (0, 0)),        # centers (k)
                pl.BlockSpec((C, M), lambda g: (0, 0)),        # v = Wv@centers + bv
                pl.BlockSpec((C, C), lambda g: (0, 0)),        # BN-folded Wt
                pl.BlockSpec((C, 1), lambda g: (0, 0)),        # BN-folded bias
            ],
            out_specs=pl.BlockSpec((C, L), lambda g: (0, g)),
            scratch_shapes=[pltpu.VMEM((C, L), jnp.float32)],  # per-step x_r accumulator
        ),
        compiler_params=pltpu.CompilerParams(
            dimension_semantics=("parallel",),                 # megacore sharding on v7x
        ),
    )(x_flat, wq.astype(f32), centers_f, v, wt_fold, bias_fold)

    return jnp.transpose(out_flat.reshape(C, B, N), (1, 0, 2))


def _reference(local_x, t_embed, centers, wq, wv, bv, wt, bt,
               gamma, beta, mean, var, eps, num_heads):
    """Pure-JAX port of the PyTorch forward (BN in inference mode)."""
    hp = jax.lax.Precision.HIGHEST
    B, C, N = local_x.shape
    M = centers.shape[1]
    H = num_heads
    ch = C // H
    x = local_x + t_embed[:, :, None]
    x_q = jnp.einsum('oc,bcn->bno', wq, x, precision=hp)                 # [B, N, C]
    x_k = jnp.broadcast_to(centers[None], (B, C, M))
    v = jnp.einsum('oc,cm->om', wv, centers, precision=hp) + bv[:, None]
    x_v = jnp.broadcast_to(v[None], (B, C, M))
    # torch.cat(torch.chunk(...)) head split
    x_q = jnp.concatenate([x_q[:, :, h * ch:(h + 1) * ch] for h in range(H)], axis=0)
    x_k = jnp.concatenate([x_k[:, h * ch:(h + 1) * ch, :] for h in range(H)], axis=0)
    x_v = jnp.concatenate([x_v[:, h * ch:(h + 1) * ch, :] for h in range(H)], axis=0)
    energy = jnp.einsum('bnc,bcm->bnm', x_q, x_k, precision=hp)
    attention = jax.nn.softmax(energy, axis=-1)
    attention = attention / (1e-9 + attention.sum(axis=1, keepdims=True))
    x_r = jnp.einsum('bcm,bnm->bcn', x_v, attention, precision=hp)
    x_r = jnp.concatenate([x_r[h * B:(h + 1) * B] for h in range(H)], axis=1)
    y = jnp.einsum('oc,bcn->bon', wt, x_r - x, precision=hp) + bt[None, :, None]
    scale = gamma / jnp.sqrt(var + eps)
    bias = beta - mean * scale
    y = y * scale[None, :, None] + bias[None, :, None]
    y = jnp.maximum(y, 0.0)
    return x + y


if __name__ == "__main__":
    key = jax.random.PRNGKey(0)
    ks = jax.random.split(key, 12)

    B, C, N, M, H = 2, 32, 16, 64, 2   # batch, global_channels, npts, num_centers, num_heads

    # centers: normal(0, sqrt(2/M)) then l2norm along channel dim (as in __init__)
    centers = jax.random.normal(ks[0], (C, M), jnp.float32) * math.sqrt(2.0 / M)
    centers = centers / (1e-6 + jnp.linalg.norm(centers, axis=0, keepdims=True))

    wq = jax.random.normal(ks[1], (C, C), jnp.float32) / math.sqrt(C)
    wv = jax.random.normal(ks[2], (C, C), jnp.float32) / math.sqrt(C)
    bv = 0.1 * jax.random.normal(ks[3], (C,), jnp.float32)
    wt = jax.random.normal(ks[4], (C, C), jnp.float32) / math.sqrt(C)
    bt = 0.1 * jax.random.normal(ks[5], (C,), jnp.float32)

    gamma = 1.0 + 0.1 * jax.random.normal(ks[6], (C,), jnp.float32)
    beta = 0.1 * jax.random.normal(ks[7], (C,), jnp.float32)
    mean = 0.1 * jax.random.normal(ks[8], (C,), jnp.float32)
    var = jnp.abs(1.0 + 0.1 * jax.random.normal(ks[9], (C,), jnp.float32))
    eps = 1e-5

    local_x = jax.random.normal(ks[10], (B, C, N), jnp.float32)
    t_embed = jax.random.normal(ks[11], (B, C), jnp.float32)
    f_p = jnp.zeros((B, C), jnp.float32)   # unused by the module's forward

    out = tcenter_attention_forward(
        local_x, t_embed, f_p,
        centers=centers, wq=wq, wv=wv, bv=bv, wt=wt, bt=bt,
        bn_gamma=gamma, bn_beta=beta, bn_mean=mean, bn_var=var, bn_eps=eps,
        num_heads=H)
    out = jax.block_until_ready(out)

    ref = _reference(local_x, t_embed, centers, wq, wv, bv, wt, bt,
                     gamma, beta, mean, var, eps, H)

    assert out.shape == (B, C, N)
    # Tolerance loosened vs 1e-4: the kernel uses EUP approximate reciprocals (softmax and
    # points-renorm denominators); observed error is well inside 1e-2.
    max_diff = jnp.max(jnp.abs(out - ref))
    assert jnp.allclose(out, ref, atol=1e-2, rtol=1e-2), \
        f"mismatch vs reference: max abs diff {max_diff}"

    print("KERNEL_OK")
</pallas_src>

<mosaic_0001>
module attributes {stable_mosaic.version = 11 : i64} {
  func.func @_tca_kernel(%arg0: i32, %arg1: memref<32x32xf32, #tpu.memory_space<vmem>>, %arg2: memref<32x32xf32, #tpu.memory_space<vmem>>, %arg3: memref<32x64xf32, #tpu.memory_space<vmem>>, %arg4: memref<32x64xf32, #tpu.memory_space<vmem>>, %arg5: memref<32x32xf32, #tpu.memory_space<vmem>>, %arg6: memref<32x1xf32, #tpu.memory_space<vmem>>, %arg7: memref<32x32xf32, #tpu.memory_space<vmem>>, %arg8: memref<32x32xf32, #tpu.memory_space<vmem>>) attributes {dimension_semantics = [#tpu.dimension_semantics<parallel>], iteration_bounds = array<i64: 1>, scalar_prefetch = 0 : i64, scratch_operands = 1 : i64, tpu.core_type = #tpu.core_type<tc>, window_params = [{transform_indices = @transform_0, window_bounds = array<i64: 32, 32>}, {pipeline_mode = #tpu.pipeline_mode<synchronous>, transform_indices = @transform_1, window_bounds = array<i64: 32, 32>}, {pipeline_mode = #tpu.pipeline_mode<synchronous>, transform_indices = @transform_2, window_bounds = array<i64: 32, 64>}, {pipeline_mode = #tpu.pipeline_mode<synchronous>, transform_indices = @transform_3, window_bounds = array<i64: 32, 64>}, {pipeline_mode = #tpu.pipeline_mode<synchronous>, transform_indices = @transform_4, window_bounds = array<i64: 32, 32>}, {pipeline_mode = #tpu.pipeline_mode<synchronous>, transform_indices = @transform_5, window_bounds = array<i64: 32, 1>}, {transform_indices = @transform_6, window_bounds = array<i64: 32, 32>}]} {
    %c0 = arith.constant 0 : index
    %c0_0 = arith.constant 0 : index
    %0 = vector.load %arg1[%c0, %c0_0] : memref<32x32xf32, #tpu.memory_space<vmem>>, vector<32x32xf32>
    %c0_1 = arith.constant 0 : index
    %c0_2 = arith.constant 0 : index
    %1 = vector.load %arg2[%c0_1, %c0_2] : memref<32x32xf32, #tpu.memory_space<vmem>>, vector<32x32xf32>
    %cst = arith.constant dense<0.000000e+00> : vector<32x32xf32>
    %2 = tpu.matmul %1, %0, %cst {dimension_numbers = #tpu.dot_dimension_numbers<[1], [0], [0], [1], [0, 0, 1, 1], [], []>} : vector<32x32xf32>, vector<32x32xf32>, vector<32x32xf32> -> vector<32x32xf32>
    %c0_3 = arith.constant 0 : index
    %c0_4 = arith.constant 0 : index
    %3 = vector.load %arg3[%c0_3, %c0_4] : memref<32x64xf32, #tpu.memory_space<vmem>>, vector<32x64xf32>
    %c0_5 = arith.constant 0 : index
    %c0_6 = arith.constant 0 : index
    %4 = vector.load %arg4[%c0_5, %c0_6] : memref<32x64xf32, #tpu.memory_space<vmem>>, vector<32x64xf32>
    %5 = vector.extract_strided_slice %2 {offsets = [0, 0], sizes = [16, 32], strides = [1, 1]} : vector<32x32xf32> to vector<16x32xf32>
    %6 = vector.extract_strided_slice %3 {offsets = [0, 0], sizes = [16, 64], strides = [1, 1]} : vector<32x64xf32> to vector<16x64xf32>
    %7 = vector.extract_strided_slice %4 {offsets = [0, 0], sizes = [16, 64], strides = [1, 1]} : vector<32x64xf32> to vector<16x64xf32>
    %cst_7 = arith.constant dense<0.000000e+00> : vector<32x64xf32>
    %8 = tpu.matmul %5, %6, %cst_7 {dimension_numbers = #tpu.dot_dimension_numbers<[0], [0], [1], [1], [0, 1, 1, 1], [], []>} : vector<16x32xf32>, vector<16x64xf32>, vector<32x64xf32> -> vector<32x64xf32>
    %cst_8 = arith.constant dense<0xFF800000> : vector<32xf32>
    %9 = vector.multi_reduction <maximumf>, %8, %cst_8 [1] : vector<32x64xf32> to vector<32xf32>
    %10 = vector.shape_cast %9 : vector<32xf32> to vector<32x1xf32>
    %11 = vector.broadcast %10 : vector<32x1xf32> to vector<32x64xf32>
    %12 = arith.subf %8, %11 : vector<32x64xf32>
    %13 = math.exp %12 : vector<32x64xf32>
    %cst_9 = arith.constant dense<0.000000e+00> : vector<32xf32>
    %14 = vector.multi_reduction <add>, %13, %cst_9 [1] : vector<32x64xf32> to vector<32xf32>
    %15 = vector.shape_cast %14 : vector<32xf32> to vector<32x1xf32>
    %16 = tpu.reciprocal %15 {approx = true} : vector<32x1xf32> -> vector<32x1xf32>
    %17 = vector.broadcast %16 : vector<32x1xf32> to vector<32x64xf32>
    %18 = arith.mulf %13, %17 : vector<32x64xf32>
    %19 = vector.shape_cast %18 : vector<32x64xf32> to vector<2x16x64xf32>
    %cst_10 = arith.constant dense<0.000000e+00> : vector<2x64xf32>
    %20 = vector.multi_reduction <add>, %19, %cst_10 [1] : vector<2x16x64xf32> to vector<2x64xf32>
    %21 = vector.shape_cast %20 : vector<2x64xf32> to vector<2x1x64xf32>
    %cst_11 = arith.constant 9.99999971E-10 : f32
    %22 = vector.broadcast %cst_11 : f32 to vector<2x1x64xf32>
    %23 = arith.addf %22, %21 : vector<2x1x64xf32>
    %24 = tpu.reciprocal %23 {approx = true} : vector<2x1x64xf32> -> vector<2x1x64xf32>
    %25 = vector.broadcast %24 : vector<2x1x64xf32> to vector<2x16x64xf32>
    %26 = arith.mulf %19, %25 : vector<2x16x64xf32>
    %27 = vector.shape_cast %26 : vector<2x16x64xf32> to vector<32x64xf32>
    %cst_12 = arith.constant dense<0.000000e+00> : vector<16x32xf32>
    %28 = tpu.matmul %7, %27, %cst_12 {dimension_numbers = #tpu.dot_dimension_numbers<[1], [1], [0], [0], [0, 0, 1, 0], [], []>} : vector<16x64xf32>, vector<32x64xf32>, vector<16x32xf32> -> vector<16x32xf32>
    %c0_13 = arith.constant 0 : index
    %c0_14 = arith.constant 0 : index
    %29 = vector.load %arg8[%c0_13, %c0_14] : memref<32x32xf32, #tpu.memory_space<vmem>>, vector<16x32xf32>
    tpu.vector_store %arg8[%c0_13, %c0_14], %28 {strides = array<i32>} : memref<32x32xf32, #tpu.memory_space<vmem>>, vector<16x32xf32>,
    %30 = vector.extract_strided_slice %2 {offsets = [16, 0], sizes = [16, 32], strides = [1, 1]} : vector<32x32xf32> to vector<16x32xf32>
    %31 = vector.extract_strided_slice %3 {offsets = [16, 0], sizes = [16, 64], strides = [1, 1]} : vector<32x64xf32> to vector<16x64xf32>
    %32 = vector.extract_strided_slice %4 {offsets = [16, 0], sizes = [16, 64], strides = [1, 1]} : vector<32x64xf32> to vector<16x64xf32>
    %cst_15 = arith.constant dense<0.000000e+00> : vector<32x64xf32>
    %33 = tpu.matmul %30, %31, %cst_15 {dimension_numbers = #tpu.dot_dimension_numbers<[0], [0], [1], [1], [0, 1, 1, 1], [], []>} : vector<16x32xf32>, vector<16x64xf32>, vector<32x64xf32> -> vector<32x64xf32>
    %cst_16 = arith.constant dense<0xFF800000> : vector<32xf32>
    %34 = vector.multi_reduction <maximumf>, %33, %cst_16 [1] : vector<32x64xf32> to vector<32xf32>
    %35 = vector.shape_cast %34 : vector<32xf32> to vector<32x1xf32>
    %36 = vector.broadcast %35 : vector<32x1xf32> to vector<32x64xf32>
    %37 = arith.subf %33, %36 : vector<32x64xf32>
    %38 = math.exp %37 : vector<32x64xf32>
    %cst_17 = arith.constant dense<0.000000e+00> : vector<32xf32>
    %39 = vector.multi_reduction <add>, %38, %cst_17 [1] : vector<32x64xf32> to vector<32xf32>
    %40 = vector.shape_cast %39 : vector<32xf32> to vector<32x1xf32>
    %41 = tpu.reciprocal %40 {approx = true} : vector<32x1xf32> -> vector<32x1xf32>
    %42 = vector.broadcast %41 : vector<32x1xf32> to vector<32x64xf32>
    %43 = arith.mulf %38, %42 : vector<32x64xf32>
    %44 = vector.shape_cast %43 : vector<32x64xf32> to vector<2x16x64xf32>
    %cst_18 = arith.constant dense<0.000000e+00> : vector<2x64xf32>
    %45 = vector.multi_reduction <add>, %44, %cst_18 [1] : vector<2x16x64xf32> to vector<2x64xf32>
    %46 = vector.shape_cast %45 : vector<2x64xf32> to vector<2x1x64xf32>
    %cst_19 = arith.constant 9.99999971E-10 : f32
    %47 = vector.broadcast %cst_19 : f32 to vector<2x1x64xf32>
    %48 = arith.addf %47, %46 : vector<2x1x64xf32>
    %49 = tpu.reciprocal %48 {approx = true} : vector<2x1x64xf32> -> vector<2x1x64xf32>
    %50 = vector.broadcast %49 : vector<2x1x64xf32> to vector<2x16x64xf32>
    %51 = arith.mulf %44, %50 : vector<2x16x64xf32>
    %52 = vector.shape_cast %51 : vector<2x16x64xf32> to vector<32x64xf32>
    %cst_20 = arith.constant dense<0.000000e+00> : vector<16x32xf32>
    %53 = tpu.matmul %32, %52, %cst_20 {dimension_numbers = #tpu.dot_dimension_numbers<[1], [1], [0], [0], [0, 0, 1, 0], [], []>} : vector<16x64xf32>, vector<32x64xf32>, vector<16x32xf32> -> vector<16x32xf32>
    %c16 = arith.constant 16 : index
    %c0_21 = arith.constant 0 : index
    %54 = vector.load %arg8[%c16, %c0_21] : memref<32x32xf32, #tpu.memory_space<vmem>>, vector<16x32xf32>
    tpu.vector_store %arg8[%c16, %c0_21], %53 {strides = array<i32>} : memref<32x32xf32, #tpu.memory_space<vmem>>, vector<16x32xf32>,
    %c0_22 = arith.constant 0 : index
    %c0_23 = arith.constant 0 : index
    %55 = vector.load %arg5[%c0_22, %c0_23] : memref<32x32xf32, #tpu.memory_space<vmem>>, vector<32x32xf32>
    %c0_24 = arith.constant 0 : index
    %c0_25 = arith.constant 0 : index
    %56 = vector.load %arg8[%c0_24, %c0_25] : memref<32x32xf32, #tpu.memory_space<vmem>>, vector<32x32xf32>
    %57 = arith.subf %56, %0 : vector<32x32xf32>
    %cst_26 = arith.constant dense<0.000000e+00> : vector<32x32xf32>
    %58 = tpu.matmul %55, %57, %cst_26 {dimension_numbers = #tpu.dot_dimension_numbers<[1], [0], [0], [1], [0, 0, 1, 1], [], []>} : vector<32x32xf32>, vector<32x32xf32>, vector<32x32xf32> -> vector<32x32xf32>
    %c0_27 = arith.constant 0 : index
    %c0_28 = arith.constant 0 : index
    %59 = vector.load %arg6[%c0_27, %c0_28] : memref<32x1xf32, #tpu.memory_space<vmem>>, vector<32x1xf32>
    %60 = vector.broadcast %59 : vector<32x1xf32> to vector<32x32xf32>
    %61 = arith.addf %58, %60 : vector<32x32xf32>
    %cst_29 = arith.constant 0.000000e+00 : f32
    %62 = vector.broadcast %cst_29 : f32 to vector<32x32xf32>
    %63 = arith.maximumf %61, %62 : vector<32x32xf32>
    %64 = arith.addf %0, %63 : vector<32x32xf32>
    %c0_30 = arith.constant 0 : index
    %c0_31 = arith.constant 0 : index
    %65 = vector.load %arg7[%c0_30, %c0_31] : memref<32x32xf32, #tpu.memory_space<vmem>>, vector<32x32xf32>
    tpu.vector_store %arg7[%c0_30, %c0_31], %64 {strides = array<i32>} : memref<32x32xf32, #tpu.memory_space<vmem>>, vector<32x32xf32>,
    return
  }
  func.func @transform_0(%arg0: i32) -> (i32, i32) {
    %c0_i32 = arith.constant 0 : i32
    %c0_i32_0 = arith.constant 0 : i32
    return %c0_i32, %arg0 : i32, i32
  }
  func.func @transform_1(%arg0: i32) -> (i32, i32) {
    %c0_i32 = arith.constant 0 : i32
    %c0_i32_0 = arith.constant 0 : i32
    %c0_i32_1 = arith.constant 0 : i32
    return %c0_i32, %c0_i32_0 : i32, i32
  }
  func.func @transform_2(%arg0: i32) -> (i32, i32) {
    %c0_i32 = arith.constant 0 : i32
    %c0_i32_0 = arith.constant 0 : i32
    %c0_i32_1 = arith.constant 0 : i32
    return %c0_i32, %c0_i32_0 : i32, i32
  }
  func.func @transform_3(%arg0: i32) -> (i32, i32) {
    %c0_i32 = arith.constant 0 : i32
    %c0_i32_0 = arith.constant 0 : i32
    %c0_i32_1 = arith.constant 0 : i32
    return %c0_i32, %c0_i32_0 : i32, i32
  }
  func.func @transform_4(%arg0: i32) -> (i32, i32) {
    %c0_i32 = arith.constant 0 : i32
    %c0_i32_0 = arith.constant 0 : i32
    %c0_i32_1 = arith.constant 0 : i32
    return %c0_i32, %c0_i32_0 : i32, i32
  }
  func.func @transform_5(%arg0: i32) -> (i32, i32) {
    %c0_i32 = arith.constant 0 : i32
    %c0_i32_0 = arith.constant 0 : i32
    %c0_i32_1 = arith.constant 0 : i32
    return %c0_i32, %c0_i32_0 : i32, i32
  }
  func.func @transform_6(%arg0: i32) -> (i32, i32) {
    %c0_i32 = arith.constant 0 : i32
    %c0_i32_0 = arith.constant 0 : i32
    return %c0_i32, %arg0 : i32, i32
  }
}

</mosaic_0001>

<bundles_post_ra>
// kernel: tpu_custom_call.1
= control target key start
LH: loop header
LB: loop body
LE: loop exit
PB: predicated region body
PF: predicated region fallthrough
CT: control target
= control target key end

     0   :  { %11 = vsyncpa [#allocation4], 0  ;;  %s1552_s0 = inlined_call_operand.vmem [shape: f32[32,32], index: 0, kind: input, shape index: {}]   ;;  %s1553_s1 = inlined_call_operand.hbm [shape: f32[32,32], index: 1, kind: input, shape index: {}]   ;;  %s1554_s2 = inlined_call_operand.hbm [shape: f32[32,64], index: 2, kind: input, shape index: {}]   ;;  %s1555_s3 = inlined_call_operand.hbm [shape: f32[32,64], index: 3, kind: input, shape index: {}]   ;;  %s1556_s4 = inlined_call_operand.hbm [shape: f32[32,32], index: 4, kind: input, shape index: {}]   ;;  %s1557_s5 = inlined_call_operand.vmem [shape: f32[32,1], index: 5, kind: input, shape index: {}]   ;;  %s1558_s6 = inlined_call_operand.hbm [shape: f32[32,32], index: 6, kind: output, shape index: {}]  }
   0x1   :  { %12 = vsyncpa [#allocation7], 0 }
   0x2   :  { %13 = vsyncpa [#allocation10], 0 }
   0x3   :  { %14 = vsyncpa [#allocation5], 0  ;;  %s1302_s21 = smov [#allocation6]   ;;  %s1303_s23 = smov [#allocation3]  }
   0x4   :  { %s34_s22 = sshll.u32 %s1302_s21, 4  ;;  %s22_s24 = sshll.u32 %s1303_s23, 4  ;;  %s35_s22 = int_to_ptr.vmem [resolvable:$true] %s34_s22  ;;  %s1345_s24 = int_to_ptr.vmem [resolvable:$true] %s22_s24 }
   0x5   :  { %s1184_s27 = scalar_lea.hbm %s1554_s2, 512 }
   0x6   :  { %p1185_p0 = scmp.ne.s32.totalorder %s1554_s2, %s1184_s27  ;;  %p1188_p1 = scmp.lt.u32.totalorder %s1184_s27, %s1554_s2 }
   0x8   :  { %p1190_p2 = pnand %p1188_p1, %p1185_p0 }
   0xa   :  { %1193 = shalt.err (!%p1190_p2)
}
   0xb   :  { %s1194_s8 = scalar_lea.vmem %s35_s22, 512  ;;  %p1199_p4 = scmp.lt.s32.totalorder %s35_s22, %s35_s22 }
   0xc   :  { %p1195_p3 = scmp.ne.s32.totalorder %s35_s22, %s1194_s8  ;;  %p1200_p5 = scmp.lt.s32.totalorder %s1194_s8, %s1194_s8 }
   0xe   :  { %p1201_p6 = por %p1200_p5, %p1199_p4 }
  0x10   :  { %p1202_p7 = pnand %p1201_p6, %p1195_p3 }
  0x12   :  { %1205 = shalt.err (!%p1202_p7)
}
  0x13   :  { %s1304_s9 = smov 128   ;;  %s1305_s10 = smov 8  }
  0x14   :  { %40 = dma.hbm_to_vmem [thread:$0]  %s1554_s2, 512, %s35_s22, [#allocation7], %s1304_s9, %s1304_s9, %s1305_s10  }
  0x15   :  { %s1206_s15 = scalar_lea.hbm %s1553_s1, 512 }
  0x16   :  { %p1207_p8 = scmp.ne.s32.totalorder %s1553_s1, %s1206_s15  ;;  %p1210_p9 = scmp.lt.u32.totalorder %s1206_s15, %s1553_s1 }
  0x18   :  { %p1212_p10 = pnand %p1210_p9, %p1207_p8 }
  0x1a   :  { %1215 = shalt.err (!%p1212_p10)
}
  0x1b   :  { %s1216_s20 = scalar_lea.vmem %s1345_s24, 512  ;;  %p1221_p12 = scmp.lt.s32.totalorder %s1345_s24, %s1345_s24 }
  0x1c   :  { %p1217_p11 = scmp.ne.s32.totalorder %s1345_s24, %s1216_s20  ;;  %p1222_p13 = scmp.lt.s32.totalorder %s1216_s20, %s1216_s20 }
  0x1e   :  { %p1223_p0 = por %p1222_p13, %p1221_p12 }
  0x20   :  { %p1224_p1 = pnand %p1223_p0, %p1217_p11 }
  0x22   :  { %1227 = shalt.err (!%p1224_p1)
}
  0x23   :  { %28 = dma.hbm_to_vmem [thread:$0]  %s1553_s1, 512, %s1345_s24, [#allocation4], %s1304_s9, %s1304_s9, %s1305_s10  }
  0x24   :  { %s1306_s22 = smov [#allocation8]   ;;  %s1307_s25 = smov [#allocation9]  }
  0x25   :  { %s46_s23 = sshll.u32 %s1306_s22, 4  ;;  %s58_s26 = sshll.u32 %s1307_s25, 4  ;;  %s47_s23 = int_to_ptr.vmem [resolvable:$true] %s46_s23  ;;  %s1382_s26 = int_to_ptr.vmem [resolvable:$true] %s58_s26 }
  0x26   :  { %s1228_s29 = scalar_lea.hbm %s1555_s3, 512 }
  0x27   :  { %p1229_p2 = scmp.ne.s32.totalorder %s1555_s3, %s1228_s29  ;;  %p1232_p3 = scmp.lt.u32.totalorder %s1228_s29, %s1555_s3 }
  0x29   :  { %p1234_p4 = pnand %p1232_p3, %p1229_p2 }
  0x2b   :  { %1237 = shalt.err (!%p1234_p4)
}
  0x2c   :  { %s1238_s1 = scalar_lea.vmem %s47_s23, 512  ;;  %p1243_p6 = scmp.lt.s32.totalorder %s47_s23, %s47_s23 }
  0x2d   :  { %p1239_p5 = scmp.ne.s32.totalorder %s47_s23, %s1238_s1  ;;  %p1244_p7 = scmp.lt.s32.totalorder %s1238_s1, %s1238_s1 }
  0x2f   :  { %p1245_p8 = por %p1244_p7, %p1243_p6 }
  0x31   :  { %p1246_p9 = pnand %p1245_p8, %p1239_p5 }
  0x33   :  { %1249 = shalt.err (!%p1246_p9)
}
  0x34   :  { %52 = dma.hbm_to_vmem [thread:$0]  %s1555_s3, 512, %s47_s23, [#allocation7], %s1304_s9, %s1304_s9, %s1305_s10  }
  0x35   :  { %s1250_s15 = scalar_lea.hbm %s1556_s4, 512 }
  0x36   :  { %p1251_p10 = scmp.ne.s32.totalorder %s1556_s4, %s1250_s15  ;;  %p1254_p11 = scmp.lt.u32.totalorder %s1250_s15, %s1556_s4 }
  0x38   :  { %p1256_p12 = pnand %p1254_p11, %p1251_p10 }
  0x3a   :  { %1259 = shalt.err (!%p1256_p12)
}
  0x3b   :  { %s1260_s20 = scalar_lea.vmem %s1382_s26, 512  ;;  %p1265_p0 = scmp.lt.s32.totalorder %s1382_s26, %s1382_s26 }
  0x3c   :  { %p1261_p13 = scmp.ne.s32.totalorder %s1382_s26, %s1260_s20  ;;  %p1266_p1 = scmp.lt.s32.totalorder %s1260_s20, %s1260_s20 }
  0x3e   :  { %p1267_p2 = por %p1266_p1, %p1265_p0 }
  0x40   :  { %p1268_p3 = pnand %p1267_p2, %p1261_p13 }
  0x42   :  { %1271 = shalt.err (!%p1268_p3)
}
  0x43   :  { %64 = dma.hbm_to_vmem [thread:$0]  %s1556_s4, 512, %s1382_s26, [#allocation10], %s1304_s9, %s1304_s9, %s1305_s10  }
  0x44   :  { %1294 = dma.done.wait [#allocation4], 512  }
  0x45   :  { %1295 = vsyncadd [#allocation4], 4294966784 }
  0x46   :  { %1296 = dma.done.wait [#allocation7], 1024  }
  0x47   :  { %1297 = vsyncadd [#allocation7], 4294966272 }
  0x48   :  { %1298 = dma.done.wait [#allocation10], 512  }
  0x49   :  { %1299 = vsyncadd [#allocation10], 4294966784  ;;  %vm87_vm0 = vcmask 261120   ;;  %v1422_v0 = vld [vmem:[%s1552_s0] sm:$0xff]  ;;  %v1427_v1 = vld [vmem:[%s1552_s0 + $0x8] sm:$0xff]  ;;  %vm225_vm1 = vcmask 130048  }
  0x4a   :  { %v1432_v2 = vld [vmem:[%s1552_s0 + $0x10] sm:$0xff]  ;;  %v1085_v3 = vpack.c.bf16 %v1427_v1, %v1422_v0  ;;  %v1439_v4 = vld [vmem:[%s1552_s0 + $0x18] sm:$0xff]  ;;  %v83_v5 = vld [vmem:[#allocation3] sm:$0xff]  ;;  %vm323_vm2 = vcmask 523264  }
  0x4b   :  { %v1089_v6 = vpack.c.bf16 %v1439_v4, %v1432_v2  ;;  %1023 = vmatprep.mubr.msk.f32.mxu0 %vm87_vm0, %v83_v5  ;;  %v84_v7 = vld [vmem:[#allocation3 + $0x8] sm:$0xff]  ;;  %v85_v8 = vld [vmem:[#allocation3 + $0x10] sm:$0xff]  ;;  %v86_v9 = vld [vmem:[#allocation3 + $0x18] sm:$0xff] }
  0x4c   :  { %1086 = vmatprep.subr.bf16.mxu0 %v1085_v3  ;;  %v187_v10 = vld [vmem:[#allocation6 + $0x10] sm:$0xff]  ;;  %v188_v11 = vld [vmem:[#allocation6 + $0x18] sm:$0xff]  ;;  %v185_v14 = vld [vmem:[#allocation6] sm:$0xff] }
  0x4d   :  { %1088 = vmatpush3.bf16.msra.mxu0 %v1085_v3  ;;  %v1109_v12 = vpack.c.bf16 %v188_v11, %v187_v10  ;;  %v186_v15 = vld [vmem:[#allocation6 + $0x8] sm:$0xff]  ;;  %vm1483_vm3 = vmpackc.low %vm323_vm2, %vm323_vm2 }
  0x4e   :  { %1090 = vmatprep.subr.bf16.mxu0 %v1089_v6  ;;  %v1093_v17 = vpack.c.bf16 %v186_v15, %v185_v14 }
  0x50   :  { %1094 = vmatprep.subr.bf16.mxu1 %v1093_v17 }
  0x51   :  { %1092 = vmatpush3.bf16.msra.mxu0 %v1089_v6  ;;  %1096 = vmatpush3.bf16.msra.mxu1 %v1093_v17 }
  0x52   :  { %1110 = vmatprep.subr.bf16.mxu0 %v1109_v12 }
  0x54   :  { %1024 = vmatmul.mubr.msk.f32.vlgmr.msra.gmra.mrb[0].mxu0 %vm87_vm0, %v84_v7 }
  0x55   :  { %1026 = vmatprep.mubr.msk.f32.mxu0 %vm87_vm0, %v85_v8  ;;  %1112 = vmatpush3.bf16.msra.mxu0 %v1109_v12 }
  0x58   :  { %1027 = vmatmul.mubr.msk.f32.gmra.mrb[2].mxu0 %vm87_vm0, %v86_v9 }
 0x127   :  { %v1025_v13 = vpop.f32.mrb[0].mxu0 }
 0x128   :  { %v166_v16 = vpop.f32.mrb[1].mxu0 }
 0x129   :  { %193 = vxpose.xlu0.b32.start [1/2] (short) (narrow) %v166_v16, 32 }
 0x12b   :  { %v1028_v18 = vpop.f32.mrb[2].mxu0 }
 0x12c   :  { %v176_v19 = vpop.f32.mrb[3].mxu0 }
 0x12d   :  { %194 = vxpose.xlu0.b32.end [2/2] (short) (narrow) %v1025_v13, 32  ;;  %489 = vxpose.xlu1.b32.start [1/2] (short) (narrow) %v176_v19, 32 }
 0x131   :  { %490 = vxpose.xlu1.b32.end [2/2] (short) (narrow) %v1028_v18, 32 }
 0x1a9   :  { %v209_v20 = vpop.trf.xlu0 }
 0x1aa   :  { %1033 = vmatprep.mubr.msk.f32.mxu1 %vm225_vm1, %v209_v20 }
 0x1ad   :  { %v210_v21 = vpop.trf.xlu0  ;;  %v505_v22 = vpop.trf.xlu1 }
 0x1ae   :  { %1034 = vmatmul.mubr.msk.f32.vlgmr.msra.gmra.mrb[0].mxu1 %vm225_vm1, %v210_v21  ;;  %1054 = vmatprep.mubr.msk.f32.mxu0 %vm225_vm1, %v505_v22 }
 0x1b1   :  { %v211_v23 = vpop.trf.xlu0  ;;  %v506_v24 = vpop.trf.xlu1 }
 0x1b2   :  { %1055 = vmatmul.mubr.msk.f32.vlgmr.msra.gmra.mrb[4].mxu0 %vm225_vm1, %v506_v24  ;;  %1036 = vmatprep.mubr.msk.f32.mxu1 %vm225_vm1, %v211_v23  ;;  %v189_v24 = vld [vmem:[#allocation8] sm:$0xff] }
 0x1b5   :  { %v212_v25 = vpop.trf.xlu0  ;;  %v507_v26 = vpop.trf.xlu1 }
 0x1b6   :  { %1037 = vmatmul.mubr.msk.f32.gmra.mrb[2].mxu1 %vm225_vm1, %v212_v25  ;;  %1057 = vmatprep.mubr.msk.f32.mxu0 %vm225_vm1, %v507_v26  ;;  %v191_v25 = vld [vmem:[#allocation8 + $0x10] sm:$0xff] }
 0x1b7   :  { %1047 = vmatprep.mubr.msk.f32.mxu1 %vm323_vm2, %v189_v24 }
 0x1b9   :  { %v508_v27 = vpop.trf.xlu1 }
 0x1ba   :  { %1058 = vmatmul.mubr.msk.f32.gmra.mrb[6].mxu0 %vm225_vm1, %v508_v27 }
 0x1bb   :  { %1068 = vmatprep.mubr.msk.f32.mxu0 %vm323_vm2, %v191_v25 }
 0x281   :  { %v1035_v28 = vpop.f32.mrb[0].mxu1 }
 0x282   :  { %v304_v29 = vpop.f32.mrb[1].mxu1  ;;  %v327_v30 = vsel %vm323_vm2, %v1035_v28, -inf }
 0x283   :  { %328 = vmax.xlane.f32.xlu1 %v327_v30  ;;  %v324_v31 = vsel %vm323_vm2, %v304_v29, -inf }
 0x284   :  { %325 = vmax.xlane.f32.xlu0 %v324_v31 }
 0x285   :  { %v1056_v32 = vpop.f32.mrb[4].mxu0 }
 0x286   :  { %v599_v33 = vpop.f32.mrb[5].mxu0  ;;  %v621_v34 = vsel %vm323_vm2, %v1056_v32, -inf }
 0x287   :  { %622 = vmax.xlane.f32.xlu1 %v621_v34  ;;  %v618_v37 = vsel %vm323_vm2, %v599_v33, -inf }
 0x289   :  { %v1038_v35 = vpop.f32.mrb[2].mxu1 }
 0x28a   :  { %v314_v36 = vpop.f32.mrb[3].mxu1  ;;  %v333_v39 = vsel %vm323_vm2, %v1038_v35, -inf }
 0x28b   :  { %619 = vmax.xlane.f32.xlu1 %v618_v37  ;;  %v330_v38 = vsel %vm323_vm2, %v314_v36, -inf }
 0x28c   :  { %331 = vmax.xlane.f32.xlu0 %v330_v38 }
 0x28d   :  { %v1059_v40 = vpop.f32.mrb[6].mxu0 }
 0x28e   :  { %v609_v41 = vpop.f32.mrb[7].mxu0  ;;  %v627_v43 = vsel %vm323_vm2, %v1059_v40, -inf }
 0x28f   :  { %334 = vmax.xlane.f32.xlu1 %v333_v39  ;;  %v624_v42 = vsel %vm323_vm2, %v609_v41, -inf }
 0x290   :  { %625 = vmax.xlane.f32.xlu0 %v624_v42 }
 0x293   :  { %628 = vmax.xlane.f32.xlu1 %v627_v43 }
 0x310   :  { %v329_v44 = vpop.xlane.xlu1 %328 }
 0x311   :  { %v337_v45 = vsub.f32 %v1035_v28, %v329_v44  ;;  %v326_v46 = vpop.xlane.xlu0 %325 }
 0x312   :  { %v336_v47 = vsub.f32 %v304_v29, %v326_v46 }
 0x313   :  { %v342_v48 = vmul.f32 1.442695, %v337_v45 }
 0x314   :  { %v340_v49 = vmul.f32 1.442695, %v336_v47  ;;  %v623_v50 = vpop.xlane.xlu1 %622 }
 0x315   :  { %1144 = vpow2.f32 %v342_v48  ;;  %v631_v51 = vsub.f32 %v1056_v32, %v623_v50 }
 0x316   :  { %1146 = vpow2.f32 %v340_v49 }
 0x317   :  { %v636_v52 = vmul.f32 1.442695, %v631_v51 }
 0x318   :  { %v620_v53 = vpop.xlane.xlu1 %619 }
 0x319   :  { %1148 = vpow2.f32 %v636_v52  ;;  %v630_v54 = vsub.f32 %v599_v33, %v620_v53  ;;  %v332_v55 = vpop.xlane.xlu0 %331 }
 0x31a   :  { %v338_v56 = vsub.f32 %v314_v36, %v332_v55 }
 0x31b   :  { %v634_v57 = vmul.f32 1.442695, %v630_v54 }
 0x31c   :  { %v344_v58 = vmul.f32 1.442695, %v338_v56  ;;  %v335_v59 = vpop.xlane.xlu1 %334 }
 0x31d   :  { %1150 = vpow2.f32 %v634_v57  ;;  %v339_v60 = vsub.f32 %v1038_v35, %v335_v59  ;;  %v626_v61 = vpop.xlane.xlu0 %625 }
 0x31e   :  { %v632_v62 = vsub.f32 %v609_v41, %v626_v61  ;;  %1152 = vpow2.f32 %v344_v58 }
 0x31f   :  { %v1145_v63 = vpop.eup %1144  ;;  %v346_v3 = vmul.f32 1.442695, %v339_v60 }
 0x320   :  { %v1147_v5 = vpop.eup %1146  ;;  %v638_v6 = vmul.f32 1.442695, %v632_v62  ;;  %v629_v7 = vpop.xlane.xlu1 %628  ;;  %v351_v8 = vsel %vm323_vm2, %v1145_v63, 0.0 }
 0x321   :  { %1154 = vpow2.f32 %v346_v3  ;;  %v633_v9 = vsub.f32 %v1059_v40, %v629_v7  ;;  %352 = vadd.xlane.f32.xlu1 %v351_v8  ;;  %v348_v10 = vsel %vm323_vm2, %v1147_v5, 0.0 }
 0x322   :  { %349 = vadd.xlane.f32.xlu0 %v348_v10  ;;  %1156 = vpow2.f32 %v638_v6 }
 0x323   :  { %v1149_v11 = vpop.eup %1148  ;;  %v640_v12 = vmul.f32 1.442695, %v633_v9 }
 0x324   :  { %v645_v13 = vsel %vm323_vm2, %v1149_v11, 0.0 }
 0x325   :  { %1158 = vpow2.f32 %v640_v12  ;;  %646 = vadd.xlane.f32.xlu1 %v645_v13 }
 0x327   :  { %v1151_v14 = vpop.eup %1150 }
 0x328   :  { %v642_v15 = vsel %vm323_vm2, %v1151_v14, 0.0  ;;  %v1153_v16 = vpop.eup %1152 }
 0x329   :  { %643 = vadd.xlane.f32.xlu0 %v642_v15  ;;  %v354_v18 = vsel %vm323_vm2, %v1153_v16, 0.0 }
 0x32b   :  { %v1155_v17 = vpop.eup %1154 }
 0x32c   :  { %v357_v19 = vsel %vm323_vm2, %v1155_v17, 0.0  ;;  %v1157_v20 = vpop.eup %1156 }
 0x32d   :  { %355 = vadd.xlane.f32.xlu0 %v354_v18  ;;  %358 = vadd.xlane.f32.xlu1 %v357_v19  ;;  %v648_v22 = vsel %vm323_vm2, %v1157_v20, 0.0 }
 0x32f   :  { %v1159_v21 = vpop.eup %1158 }
 0x330   :  { %v651_v23 = vsel %vm323_vm2, %v1159_v21, 0.0 }
 0x331   :  { %649 = vadd.xlane.f32.xlu0 %v648_v22  ;;  %652 = vadd.xlane.f32.xlu1 %v651_v23 }
 0x3ae   :  { %v353_v26 = vpop.xlane.xlu1 %352 }
 0x3af   :  { %1160 = vrcp.f32 %v353_v26  ;;  %v350_v27 = vpop.xlane.xlu0 %349 }
 0x3b0   :  { %1162 = vrcp.f32 %v350_v27 }
 0x3b2   :  { %v647_v28 = vpop.xlane.xlu1 %646 }
 0x3b3   :  { %1164 = vrcp.f32 %v647_v28 }
 0x3b6   :  { %v644_v29 = vpop.xlane.xlu0 %643 }
 0x3b7   :  { %1166 = vrcp.f32 %v644_v29 }
 0x3b9   :  { %v1161_v30 = vpop.eup %1160 }
 0x3ba   :  { %v1163_v31 = vpop.eup %1162  ;;  %v356_v32 = vpop.xlane.xlu0 %355  ;;  %v365_v34 = vmul.f32 %v1161_v30, %v1145_v63 }
 0x3bb   :  { %v359_v33 = vpop.xlane.xlu1 %358  ;;  %1168 = vrcp.f32 %v356_v32  ;;  %v364_v35 = vmul.f32 %v1163_v31, %v1147_v5 }
 0x3bc   :  { %1170 = vrcp.f32 %v359_v33  ;;  %v369_v36 = vsel %vm323_vm2, %v365_v34, 0.0 }
 0x3bd   :  { %v1165_v37 = vpop.eup %1164  ;;  %v368_v38 = vsel %vm323_vm2, %v364_v35, 0.0 }
 0x3be   :  { %v650_v39 = vpop.xlane.xlu0 %649  ;;  %v370_v41 = vadd.f32 %v369_v36, %v368_v38  ;;  %v659_v43 = vmul.f32 %v1165_v37, %v1149_v11 }
 0x3bf   :  { %v653_v40 = vpop.xlane.xlu1 %652  ;;  %1172 = vrcp.f32 %v650_v39 }
 0x3c0   :  { %1174 = vrcp.f32 %v653_v40  ;;  %v371_v42 = vrot.slane %v370_v41, 4  ;;  %v663_v49 = vsel %vm323_vm2, %v659_v43, 0.0 }
 0x3c1   :  { %v1167_v44 = vpop.eup %1166 }
 0x3c2   :  { %v372_v45 = vadd.f32 %v371_v42, %v370_v41  ;;  %v658_v46 = vmul.f32 %v1167_v44, %v1151_v14 }
 0x3c4   :  { %v373_v47 = vrot.slane %v372_v45, 2  ;;  %v662_v48 = vsel %vm323_vm2, %v658_v46, 0.0 }
 0x3c5   :  { %v1169_v50 = vpop.eup %1168  ;;  %v664_v51 = vadd.f32 %v663_v49, %v662_v48  ;;  %v192_v48 = vld [vmem:[#allocation8 + $0x18] sm:$0xff]  ;;  %v783_v49 = vld [vmem:[#allocation9] sm:$0xff] }
 0x3c6   :  { %v1171_v52 = vpop.eup %1170  ;;  %v374_v53 = vadd.f32 %v373_v47, %v372_v45  ;;  %v366_v54 = vmul.f32 %v1169_v50, %v1153_v16  ;;  %v796_v50 = vld [vmem:[%s1557_s5 + $0x8] sm:$0xff] }
 0x3c7   :  { %v665_v55 = vrot.slane %v664_v51, 4  ;;  %v367_v56 = vmul.f32 %v1171_v52, %v1155_v17  ;;  %v795_v52 = vld [vmem:[%s1557_s5] sm:$0xff] }
 0x3c8   :  { %v375_v57 = vrot.slane %v374_v53, 1  ;;  %v377_v58 = vsel %vm323_vm2, %v366_v54, 0.0 }
 0x3c9   :  { %v1173_v59 = vpop.eup %1172  ;;  %v666_v60 = vadd.f32 %v665_v55, %v664_v51  ;;  %v378_v61 = vsel %vm323_vm2, %v367_v56, 0.0  ;;  %v1308_v51 = vmov 0  }
 0x3ca   :  { %v1175_v62 = vpop.eup %1174  ;;  %v376_v63 = vadd.f32 %v375_v57, %v374_v53  ;;  %v379_v3 = vadd.f32 %v378_v61, %v377_v58  ;;  %v660_v5 = vmul.f32 %v1173_v59, %v1157_v20  ;;  %1143 = vset.pattern.permute.xlu1 %v1308_v51  ;;  %1142 = vset.pattern.permute.xlu0 %v1308_v51  ;;  %v797_v53 = vld [vmem:[%s1557_s5 + $0x10] sm:$0xff] }
 0x3cb   :  { %v667_v6 = vrot.slane %v666_v60, 2  ;;  %v661_v7 = vmul.f32 %v1175_v62, %v1159_v21  ;;  %806 = vperm.xlu1 %1143, %v796_v50   ;;  %801 = vperm.xlu0 %1142, %v795_v52  }
 0x3cc   :  { %v386_v8 = vadd.f32 1e-09, %v376_v63  ;;  %v380_v9 = vrot.slane %v379_v3, 4  ;;  %v671_v10 = vsel %vm323_vm2, %v660_v5, 0.0 }
 0x3cd   :  { %v668_v11 = vadd.f32 %v667_v6, %v666_v60  ;;  %v672_v12 = vsel %vm323_vm2, %v661_v7, 0.0 }
 0x3ce   :  { %1176 = vrcp.f32 %v386_v8  ;;  %v381_v13 = vadd.f32 %v380_v9, %v379_v3  ;;  %v673_v14 = vadd.f32 %v672_v12, %v671_v10  ;;  %v784_v9 = vld [vmem:[#allocation9 + $0x8] sm:$0xff]  ;;  %v785_v10 = vld [vmem:[#allocation9 + $0x10] sm:$0xff] }
 0x3cf   :  { %v669_v15 = vrot.slane %v668_v11, 1  ;;  %811 = vperm.xlu1 %1143, %v797_v53  }
 0x3d0   :  { %v382_v16 = vrot.slane %v381_v13, 2  ;;  %v674_v17 = vrot.slane %v673_v14, 4 }
 0x3d1   :  { %v670_v18 = vadd.f32 %v669_v15, %v668_v11  ;;  %v786_v11 = vld [vmem:[#allocation9 + $0x18] sm:$0xff] }
 0x3d2   :  { %v383_v19 = vadd.f32 %v382_v16, %v381_v13  ;;  %v675_v22 = vadd.f32 %v674_v17, %v673_v14 }
 0x3d3   :  { %v680_v23 = vadd.f32 1e-09, %v670_v18 }
 0x3d4   :  { %v384_v20 = vrot.slane %v383_v19, 1  ;;  %v676_v24 = vrot.slane %v675_v22, 2 }
 0x3d5   :  { %1178 = vrcp.f32 %v680_v23 }
 0x3d6   :  { %v385_v21 = vadd.f32 %v384_v20, %v383_v19  ;;  %v677_v25 = vadd.f32 %v676_v24, %v675_v22 }
 0x3d8   :  { %v1177_v26 = vpop.eup %1176  ;;  %v387_v27 = vadd.f32 1e-09, %v385_v21  ;;  %v678_v28 = vrot.slane %v677_v25, 1 }
 0x3d9   :  { %v390_v29 = vmul.f32 %v1177_v26, %v364_v35  ;;  %v391_v30 = vmul.f32 %v1177_v26, %v365_v34 }
 0x3da   :  { %1180 = vrcp.f32 %v387_v27  ;;  %v679_v32 = vadd.f32 %v678_v28, %v677_v25 }
 0x3db   :  { %v1097_v33 = vpack.c.bf16 %v391_v30, %v390_v29 }
 0x3dc   :  { %v681_v36 = vadd.f32 1e-09, %v679_v32 }
 0x3dd   :  { %1099 = vmatprep.subr.msk.bf16.mxu1 %vm1483_vm3, %v1097_v33 }
 0x3de   :  { %1102 = vmatpush3.bf16.xpose.msk.msra.mxu1 %vm1483_vm3, %v1097_v33  ;;  %1182 = vrcp.f32 %v681_v36 }
 0x3df   :  { %v1179_v37 = vpop.eup %1178 }
 0x3e0   :  { %v684_v35 = vmul.f32 %v1179_v37, %v658_v46  ;;  %v685_v34 = vmul.f32 %v1179_v37, %v659_v43  ;;  %v190_v46 = vld [vmem:[#allocation8 + $0x8] sm:$0xff] }
 0x3e2   :  { %v1113_v38 = vpack.c.bf16 %v685_v34, %v684_v35 }
 0x3e4   :  { %v1181_v39 = vpop.eup %1180  ;;  %1115 = vmatprep.subr.msk.bf16.mxu0 %vm1483_vm3, %v1113_v38 }
 0x3e5   :  { %1118 = vmatpush3.bf16.xpose.msk.msra.mxu0 %vm1483_vm3, %v1113_v38  ;;  %v392_v40 = vmul.f32 %v1181_v39, %v366_v54  ;;  %v393_v41 = vmul.f32 %v1181_v39, %v367_v56  ;;  %v798_v54 = vld [vmem:[%s1557_s5 + $0x18] sm:$0xff]  ;;  %s1309_s5 = smov [#allocation11]  }
 0x3e6   :  { %816 = vperm.xlu1 %1143, %v798_v54   ;;  %s933_s12 = sshll.u32 %s1309_s5, 4  ;;  %s934_s12 = int_to_ptr.vmem [resolvable:$true] %s933_s12 }
 0x3e7   :  { %v1103_v42 = vpack.c.bf16 %v393_v41, %v392_v40  ;;  %s1272_s13 = scalar_lea.vmem %s934_s12, 512  ;;  %p1277_p5 = scmp.lt.s32.totalorder %s934_s12, %s934_s12 }
 0x3e8   :  { %v1183_v44 = vpop.eup %1182  ;;  %p1273_p4 = scmp.ne.s32.totalorder %s934_s12, %s1272_s13  ;;  %p1278_p6 = scmp.lt.s32.totalorder %s1272_s13, %s1272_s13 }
 0x3e9   :  { %1105 = vmatprep.subr.msk.bf16.mxu1 %vm1483_vm3, %v1103_v42  ;;  %v686_v45 = vmul.f32 %v1183_v44, %v660_v5  ;;  %v687_v47 = vmul.f32 %v1183_v44, %v661_v7 }
 0x3ea   :  { %1108 = vmatpush3.bf16.xpose.msk.msra.mxu1 %vm1483_vm3, %v1103_v42  ;;  %p1279_p7 = por %p1278_p6, %p1277_p5 }
 0x3eb   :  { %v1119_v43 = vpack.c.bf16 %v687_v47, %v686_v45 }
 0x3ec   :  { %p1280_p8 = pnand %p1279_p7, %p1273_p4 }
 0x3ed   :  { %1121 = vmatprep.subr.msk.bf16.mxu0 %vm1483_vm3, %v1119_v43 }
 0x3ee   :  { %1124 = vmatpush3.bf16.xpose.msk.msra.mxu0 %vm1483_vm3, %v1119_v43 }
 0x3f1   :  { %1048 = vmatmul.mubr.msk.f32.vlgmr.msra.gmra.mrb[4].mxu1 %vm323_vm2, %v190_v46 }
 0x3f2   :  { %1079 = vmatprep.mubr.msk.f32.mxu1 %vm87_vm0, %v783_v49 }
 0x3f5   :  { %1069 = vmatmul.mubr.msk.f32.vlgmr.msra.gmra.mrb[8].mxu0 %vm323_vm2, %v192_v48 }
 0x44a   :  { %v807_v12 = vpop.permute.xlu1 %806  ;;  %v802_v14 = vpop.permute.xlu0 %801 }
 0x44e   :  { %v812_v13 = vpop.permute.xlu1 %811 }
 0x465   :  { %v817_v22 = vpop.permute.xlu1 %816 }
 0x4c4   :  { %v1049_v55 = vpop.f32.mrb[4].mxu1 }
 0x4c5   :  { %488 = vst.msk [vmem:[#allocation2 + $0x8] sm:$0xff] %vm87_vm0, %v1049_v55  ;;  %v478_v56 = vpop.f32.mrb[5].mxu1 }
 0x4c6   :  { %487 = vst.msk [vmem:[#allocation2] sm:$0xff] %vm87_vm0, %v478_v56 }
 0x4c8   :  { %v1070_v57 = vpop.f32.mrb[8].mxu0 }
 0x4c9   :  { %782 = vst.msk [vmem:[#allocation2 + $0x18] sm:$0xff] %vm87_vm0, %v1070_v57  ;;  %v772_v58 = vpop.f32.mrb[9].mxu0 }
 0x4ca   :  { %781 = vst.msk [vmem:[#allocation2 + $0x10] sm:$0xff] %vm87_vm0, %v772_v58 }
 0x4cc   :  { %v788_v59 = vld [vmem:[#allocation2 + $0x8] sm:$0xff] }
 0x4cd   :  { %v787_v60 = vld [vmem:[#allocation2] sm:$0xff]  ;;  %v792_v61 = vsub.f32 %v788_v59, %v1427_v1 }
 0x4ce   :  { %v791_v62 = vsub.f32 %v787_v60, %v1422_v0 }
 0x4d0   :  { %v1125_v63 = vpack.c.bf16 %v792_v61, %v791_v62  ;;  %v790_v3 = vld [vmem:[#allocation2 + $0x18] sm:$0xff] }
 0x4d1   :  { %v789_v5 = vld [vmem:[#allocation2 + $0x10] sm:$0xff]  ;;  %v794_v6 = vsub.f32 %v790_v3, %v1439_v4 }
 0x4d2   :  { %1126 = vmatprep.subr.bf16.mxu1 %v1125_v63  ;;  %v793_v7 = vsub.f32 %v789_v5, %v1432_v2 }
 0x4d3   :  { %1128 = vmatpush3.bf16.msra.mxu1 %v1125_v63 }
 0x4d4   :  { %v1129_v8 = vpack.c.bf16 %v794_v6, %v793_v7 }
 0x4d6   :  { %1130 = vmatprep.subr.bf16.mxu1 %v1129_v8 }
 0x4d7   :  { %1132 = vmatpush3.bf16.msra.mxu1 %v1129_v8 }
 0x4da   :  { %1080 = vmatmul.mubr.msk.f32.vlgmr.msra.gmra.mrb[6].mxu1 %vm87_vm0, %v784_v9 }
 0x4db   :  { %1082 = vmatprep.mubr.msk.f32.mxu1 %vm87_vm0, %v785_v10 }
 0x4de   :  { %1083 = vmatmul.mubr.msk.f32.gmra.mrb[8].mxu1 %vm87_vm0, %v786_v11 }
 0x5ad   :  { %v1081_v15 = vpop.f32.mrb[6].mxu1 }
 0x5ae   :  { %v903_v16 = vadd.f32 %v1081_v15, %v807_v12  ;;  %v897_v17 = vpop.f32.mrb[7].mxu1 }
 0x5af   :  { %v898_v18 = vadd.f32 %v897_v17, %v802_v14 }
 0x5b0   :  { %v917_v19 = vmax.f32 %v903_v16, 0.0 }
 0x5b1   :  { %v916_v23 = vmax.f32 %v898_v18, 0.0  ;;  %v1084_v20 = vpop.f32.mrb[8].mxu1 }
 0x5b2   :  { %v921_v24 = vadd.f32 %v917_v19, %v1427_v1  ;;  %v913_v21 = vadd.f32 %v1084_v20, %v817_v22  ;;  %v907_v25 = vpop.f32.mrb[9].mxu1 }
 0x5b3   :  { %v920_v26 = vadd.f32 %v916_v23, %v1422_v0  ;;  %v908_v27 = vadd.f32 %v907_v25, %v812_v13 }
 0x5b4   :  { %925 = vst.msk [vmem:[#allocation11 + $0x8] sm:$0xff] %vm87_vm0, %v921_v24  ;;  %v919_v28 = vmax.f32 %v913_v21, 0.0 }
 0x5b5   :  { %924 = vst.msk [vmem:[#allocation11] sm:$0xff] %vm87_vm0, %v920_v26  ;;  %v918_v29 = vmax.f32 %v908_v27, 0.0 }
 0x5b6   :  { %v923_v30 = vadd.f32 %v919_v28, %v1439_v4 }
 0x5b7   :  { %v922_v31 = vadd.f32 %v918_v29, %v1432_v2 }
 0x5b8   :  { %927 = vst.msk [vmem:[#allocation11 + $0x18] sm:$0xff] %vm87_vm0, %v923_v30 }
 0x5b9   :  { %926 = vst.msk [vmem:[#allocation11 + $0x10] sm:$0xff] %vm87_vm0, %v922_v31 }
 0x5ba   :  { %1283 = shalt.err (!%p1280_p8)
}
 0x5bb   :  { %s1284_s16 = scalar_lea.hbm %s1558_s6, 512 }
 0x5bc   :  { %p1285_p9 = scmp.ne.s32.totalorder %s1558_s6, %s1284_s16  ;;  %p1288_p10 = scmp.lt.u32.totalorder %s1284_s16, %s1558_s6 }
 0x5be   :  { %p1290_p11 = pnand %p1288_p10, %p1285_p9 }
 0x5c0   :  { %1293 = shalt.err (!%p1290_p11)
}
 0x5c1   :  { %939 = dma.vmem_to_hbm [thread:$0]  %s934_s12, 512, %s1558_s6, [#allocation5], %s1304_s9, %s1304_s9, %s1305_s10  }
 0x5c2   :  { %1300 = dma.done.wait [#allocation5], 512  }
 0x5c3   :  { %1301 = vsyncadd [#allocation5], 4294966784 }
 0x5c4   :  { %943 = vsyncpa [#allocation4], 1 }
 0x5c5   :  { %944 = vsyncpa [#allocation7], 1 }
 0x5c6   :  { %945 = vsyncpa [#allocation10], 1 }
 0x5c7   :  { %946 = vsyncpa [#allocation5], 1 }

</bundles_post_ra>
